<compile_context>
chip_gen: v5e
topology: v5e:2x2
jax: 0.10.0
libtpu: 0.0.40
codegen_flags: <defaults>
</compile_context>

<pallas_src>
import functools
import math

import jax
import jax.numpy as jnp
from jax.experimental import pallas as pl
from jax.experimental.pallas import tpu as pltpu


def _round_up(n: int, m: int) -> int:
    return ((n + m - 1) // m) * m


def _zero_pad1d_kernel(x_ref, o_ref, *, dst_left: int, copy_len: int, crop_l: int):
    """Three static-slice stores: left zeros, offset copy, right zeros."""
    t = o_ref.shape[0]
    out_len = o_ref.shape[1]
    dst_right = out_len - dst_left - copy_len

    if dst_left > 0:
        o_ref[:, :dst_left] = jnp.zeros((t, dst_left), o_ref.dtype)

    if crop_l == 0 and copy_len == x_ref.shape[1]:
        src = x_ref[...]                                  # plain copy, no shift
    else:
        src = x_ref[:, crop_l:crop_l + copy_len]          # in-kernel crop (neg pad)
    o_ref[:, dst_left:dst_left + copy_len] = src

    if dst_right > 0:
        o_ref[:, dst_left + copy_len:] = jnp.zeros((t, dst_right), o_ref.dtype)


def zero_pad1d(x: jax.Array, padding_left: int, padding_right: int) -> jax.Array:
    """Matches torch.nn.functional.pad(x, (padding_left, padding_right))."""
    lead = x.shape[:-1]
    in_len = x.shape[-1]
    out_len = in_len + padding_left + padding_right
    if out_len < 0:
        raise ValueError("negative output length from padding")

    # Fast path: no-op padding -> no HBM round trip at all.
    if padding_left == 0 and padding_right == 0:
        return x

    # Negative padding == cropping (PyTorch F.pad semantics); expressed as a
    # static in-kernel slice instead of a wrapper-side slice.
    crop_l = max(-padding_left, 0)
    crop_r = max(-padding_right, 0)
    dst_left = max(padding_left, 0)
    dst_right = max(padding_right, 0)
    copy_len = in_len - crop_l - crop_r

    rows = math.prod(lead) if lead else 1

    if rows == 0 or out_len == 0 or copy_len <= 0:
        return jnp.zeros((*lead, out_len), dtype=x.dtype)

    itemsize = jnp.dtype(x.dtype).itemsize
    sublane = max(8, 32 // itemsize)                 # 8 f32, 16 bf16, 32 int8
    lane_pad = lambda n: _round_up(max(n, 1), 128)
    per_row_bytes = (lane_pad(in_len) + lane_pad(out_len)) * itemsize

    # Total pipelined footprint budget: 2 buffers x (in tile + out tile).
    # Safe under v5e's 16 MiB scoped default and well under v6e/v7x limits.
    budget_bytes = 12 * 1024 * 1024

    narrow = out_len < 128                                       # masked-store regime
    tiny = rows < 2 * sublane or rows * out_len * itemsize < (64 << 10)
    too_long = 2 * sublane * per_row_bytes > budget_bytes        # VMEM guard

    if narrow or tiny or too_long:
        # TODO(synk): lane-dense re-layout (rows folded onto lanes) for narrow
        # out_len and a lane-dim grid axis for ultra-long rows; XLA's pad is a
        # fine bandwidth-bound fallback for these regimes.
        cfg = [(0, 0, 0)] * (x.ndim - 1) + [(padding_left, padding_right, 0)]
        return jax.lax.pad(x, jnp.zeros((), dtype=x.dtype), cfg)

    x2d = x.reshape(rows, in_len)

    # ---- tile sizing -------------------------------------------------------
    rows_padded = _round_up(rows, sublane)
    max_tile = max(sublane, (budget_bytes // (2 * per_row_bytes)) // sublane * sublane)
    min_steps = 4                                     # keep the pipeline busy
    cap_steps = _round_up(pl.cdiv(rows, min_steps), sublane)
    tile_rows = max(sublane, min(max_tile, cap_steps, rows_padded))
    grid = pl.cdiv(rows, tile_rows)
    # Best-effort even grid so the "parallel" axis shards across both v7x TCs.
    if grid > 1 and grid % 2 == 1:
        for cand in (tile_rows + sublane, tile_rows - sublane):
            if sublane <= cand <= max_tile and pl.cdiv(rows, cand) % 2 == 0:
                tile_rows = cand
                grid = pl.cdiv(rows, cand)
                break
    # -----------------------------------------------------------------------

    kernel = functools.partial(
        _zero_pad1d_kernel, dst_left=dst_left, copy_len=copy_len, crop_l=crop_l
    )

    out2d = pl.pallas_call(
        kernel,
        out_shape=jax.ShapeDtypeStruct((rows, out_len), x.dtype),
        grid_spec=pl.GridSpec(
            grid=(grid,),
            # Full last dim in each block (== array last dim), so only the row
            # tile must respect the sublane multiple; ragged last row block is
            # masked on writeback by the pipeline.
            in_specs=[pl.BlockSpec((tile_rows, in_len), lambda i: (i, 0))],
            out_specs=pl.BlockSpec((tile_rows, out_len), lambda i: (i, 0)),
        ),
        compiler_params=pltpu.CompilerParams(
            dimension_semantics=("parallel",),
        ),
    )(x2d)

    return out2d.reshape(*lead, out_len)


if __name__ == "__main__":
    key = jax.random.PRNGKey(0)
    k1, k2, k3, k4 = jax.random.split(key, 4)

    # Case 1: main Pallas path (batch=4, channels=32, length=504 -> out 512).
    x1 = jax.random.normal(k1, (4, 32, 504), dtype=jnp.float32)
    out1 = jax.block_until_ready(zero_pad1d(x1, 3, 5))
    ref1 = jnp.pad(x1, ((0, 0), (0, 0), (3, 5)))
    assert out1.shape == (4, 32, 512) and out1.dtype == x1.dtype
    assert jnp.array_equal(out1, ref1), "mismatch (case 1)"

    # Case 2: Pallas path, ragged row count and out_len not a multiple of 128.
    x2 = jax.random.normal(k2, (3, 40, 200), dtype=jnp.float32)
    out2 = jax.block_until_ready(zero_pad1d(x2, 7, 13))
    ref2 = jnp.pad(x2, ((0, 0), (0, 0), (7, 13)))
    assert jnp.array_equal(out2, ref2), "mismatch (case 2)"

    # Case 3: Pallas path with negative left padding (crop folded into kernel).
    x3 = jax.random.normal(k3, (2, 64, 300), dtype=jnp.float32)
    out3 = jax.block_until_ready(zero_pad1d(x3, -20, 36))
    ref3 = jnp.pad(x3[..., 20:], ((0, 0), (0, 0), (0, 36)))
    assert out3.shape == (2, 64, 316)
    assert jnp.array_equal(out3, ref3), "mismatch (case 3)"

    # Case 4: narrow/tiny shapes route to the lane-dense fallback.
    x4 = jax.random.normal(k4, (2, 4, 16), dtype=jnp.float32)
    out4 = jax.block_until_ready(zero_pad1d(x4, 3, 5))
    ref4 = jnp.pad(x4, ((0, 0), (0, 0), (3, 5)))
    assert jnp.array_equal(out4, ref4), "mismatch (case 4)"

    # Case 5: no-op padding fast path.
    out5 = jax.block_until_ready(zero_pad1d(x4, 0, 0))
    assert jnp.array_equal(out5, x4), "mismatch (case 5)"

    print("KERNEL_OK")
</pallas_src>

<mosaic_0001>
module attributes {stable_mosaic.version = 11 : i64} {
  func.func @_zero_pad1d_kernel(%arg0: i32, %arg1: memref<32x504xf32, #tpu.memory_space<vmem>>, %arg2: memref<32x512xf32, #tpu.memory_space<vmem>>) attributes {dimension_semantics = [#tpu.dimension_semantics<parallel>], iteration_bounds = array<i64: 4>, scalar_prefetch = 0 : i64, scratch_operands = 0 : i64, tpu.core_type = #tpu.core_type<tc>, window_params = [{transform_indices = @transform_0, window_bounds = array<i64: 32, 504>}, {transform_indices = @transform_1, window_bounds = array<i64: 32, 512>}]} {
    %cst = arith.constant 0.000000e+00 : f32
    %0 = vector.broadcast %cst : f32 to vector<32x3xf32>
    %c0 = arith.constant 0 : index
    %c0_0 = arith.constant 0 : index
    %1 = vector.load %arg2[%c0, %c0_0] : memref<32x512xf32, #tpu.memory_space<vmem>>, vector<32x3xf32>
    tpu.vector_store %arg2[%c0, %c0_0], %0 {strides = array<i32>} : memref<32x512xf32, #tpu.memory_space<vmem>>, vector<32x3xf32>,
    %c0_1 = arith.constant 0 : index
    %c0_2 = arith.constant 0 : index
    %2 = vector.load %arg1[%c0_1, %c0_2] : memref<32x504xf32, #tpu.memory_space<vmem>>, vector<32x504xf32>
    %c0_3 = arith.constant 0 : index
    %c3 = arith.constant 3 : index
    %3 = vector.load %arg2[%c0_3, %c3] : memref<32x512xf32, #tpu.memory_space<vmem>>, vector<32x504xf32>
    tpu.vector_store %arg2[%c0_3, %c3], %2 {strides = array<i32>} : memref<32x512xf32, #tpu.memory_space<vmem>>, vector<32x504xf32>,
    %cst_4 = arith.constant 0.000000e+00 : f32
    %4 = vector.broadcast %cst_4 : f32 to vector<32x5xf32>
    %c0_5 = arith.constant 0 : index
    %c507 = arith.constant 507 : index
    %5 = vector.load %arg2[%c0_5, %c507] : memref<32x512xf32, #tpu.memory_space<vmem>>, vector<32x5xf32>
    tpu.vector_store %arg2[%c0_5, %c507], %4 {strides = array<i32>} : memref<32x512xf32, #tpu.memory_space<vmem>>, vector<32x5xf32>,
    return
  }
  func.func @transform_0(%arg0: i32) -> (i32, i32) {
    %c0_i32 = arith.constant 0 : i32
    %c0_i32_0 = arith.constant 0 : i32
    return %arg0, %c0_i32 : i32, i32
  }
  func.func @transform_1(%arg0: i32) -> (i32, i32) {
    %c0_i32 = arith.constant 0 : i32
    %c0_i32_0 = arith.constant 0 : i32
    return %arg0, %c0_i32 : i32, i32
  }
}

</mosaic_0001>

<bundles_post_ra>
// kernel: tpu_custom_call.1
= control target key start
LH: loop header
LB: loop body
LE: loop exit
PB: predicated region body
PF: predicated region fallthrough
CT: control target
= control target key end

     0   :  { %6 = vsyncpa [#allocation3], 0  ;;  %s619_s0 = inlined_call_operand.vmem [shape: f32[128,504], index: 0, kind: input, shape index: {}]   ;;  %s620_s1 = inlined_call_operand.hbm [shape: f32[128,512], index: 1, kind: output, shape index: {}]  }
   0x1   :  { %8 = vsyncpa [#allocation3 + $0x1], 0  ;;  %s458_s6 = smov 0   ;;  %s460_s7 = smov 0  }
   0x2   :  { %s462_s8 = smov 0   ;;  %s464_s9 = smov 0  }
   0x3 LB: > { %s479_s10 = sadd.s32 4294967295, %s442_s9   ;;  %s320_s11 = sadd.s32 4294967294, %s442_s9   ;;  %s442_s9 = sphi %s464_s9, %s626_s9   ;;  %s438_s8 = sphi %s462_s8, %s625_s8   ;;  %s434_s7 = sphi %s460_s7, %s624_s7   ;;  %s430_s6 = sphi %s458_s6, %s623_s6  }
   0x4   : > { %s483_s12 = sadd.s32 1, %s442_s9   ;;  %s47_s13 = sadd.s32 1, %s438_s8 }
   0x5   : > { %s44_s14 = ssub.s32 %s442_s9, %s483_s12  ;;  %p57_p0 = scmp.ne.s32.totalorder %s438_s8, %s434_s7 }
   0x6   : > { %p45_p1 = scmp.eq.s32.totalorder %s44_s14, 0  ;;  %p58_p2 = scmp.eq.s32.totalorder %s479_s10, 3 }
   0x7   : > { %p63_p3 = scmp.ne.s32.totalorder %s434_s7, %s430_s6  ;;  %p64_p4 = scmp.eq.s32.totalorder %s320_s11, 3 }
   0x8   : > { %s494_s15 = scalar_select %p45_p1, %s438_s8, %s47_s13  }
   0x9   : > { %p496_p5 = por %p58_p2, %p57_p0  ;;  %p500_p6 = por %p64_p4, %p63_p3 }
   0xa   : > { %p323_p7 = scmp.ge.s32.totalorder %s442_s9, 1  ;;  %p92_p8 = scmp.lt.s32.totalorder %s442_s9, 5 }
   0xc   : > { %p93_p9 = pnand %p323_p7, %p92_p8 }
   0xd   : > { %s325_s18 = sshll.u32 (!%p93_p9), %s479_s10, 2  ;;  %s444_s23 = smov (!%p93_p9), 3  }
   0xe   : > { %96 = sbr.rel (%p93_p9) target bundleno = 184 (0xb8), region = 24  ;;  %p114_p10 = scmp.lt.s32.totalorder (!%p93_p9), %s325_s18, 15 }
   0xf   : > { %s110_s24 = sand.u32 (!%p93_p9), 1, %s434_s7   ;;  %s336_s27 = sshll.u32 (!%p93_p9), %s479_s10, 7 }
  0x10   : > { %s324_s25 = sshll.u32 (!%p93_p9), %s110_s24, 7  ;;  %s254_s30 = scalar_lea.hbm (!%p93_p9), %s620_s1, %s336_s27 }
  0x11   : > { %s531_s26 = scalar_lea.vmem (!%p93_p9), [#allocation2], %s324_s25  ;;  %s257_s3 = sshll.u32 (!%p93_p9), %s254_s30, 4  ;;  %s258_s3 = int_to_ptr.hbm [resolvable:$true] %s257_s3 }
  0x12   : > { %s255_s2 = sshll.u32 (!%p93_p9), %s531_s26, 4  ;;  %s242_s4 = scalar_lea.sflag (!%p93_p9), [#allocation3], %s110_s24  ;;  %s256_s2 = int_to_ptr.vmem [resolvable:$true] %s255_s2 }
  0x13   : > { %s628_s18 = smov (!%p114_p10, %s325_s18), 15  ;;  %vm121_vm0 = vcmask 23552   ;;  %v445_v16 = vmov 0.0   ;;  %vm222_vm1 = vcmask 1006592   ;;  %vm236_vm2 = vcmask 1048536   ;;  %s394_s5 = sshra.s32 %s258_s3, 4  ;;  %s395_s5 = int_to_ptr.hbm [resolvable:$true] %s394_s5 }
  0x14   : > { %s334_s19 = sshll.u32 %s628_s18, 5  ;;  %122 = vst.msk [vmem:[%s531_s26] sm:$0xff] %vm121_vm0, %v445_v16  ;;  %vm218_vm3 = vcmask 1047576   ;;  %s396_s10 = scalar_lea.hbm %s395_s5, 128 }
  0x15   : > { %s510_s22 = scalar_lea.vmem %s619_s0, %s334_s19  ;;  %123 = vst.msk [vmem:[%s531_s26 + $0x20] sm:$0xff] %vm121_vm0, %v445_v16  ;;  %p397_p11 = scmp.ne.s32.totalorder %s395_s5, %s396_s10 }
  0x16   : > { %v128_v0 = vld [vmem:[%s510_s22 + $0x10] sm:$0xff]  ;;  %v126_v1 = vld [vmem:[%s510_s22] sm:$0xff]  ;;  %v129_v3 = vld [vmem:[%s510_s22 + $0x18] sm:$0xff]  ;;  %124 = vst.msk [vmem:[%s531_s26 + $0x40] sm:$0xff] %vm121_vm0, %v445_v16  ;;  %s400_s14 = scalar_lea.hbm %s620_s1, 512  ;;  %p401_p0 = scmp.lt.s32.totalorder %s395_s5, %s620_s1 }
  0x17   : > { %v132_v2 = vld [vmem:[%s510_s22 + $0x30] sm:$0xff]  ;;  %162 = vrot.lane.b32.xlu1 %v128_v0, %s444_s23  ;;  %158 = vrot.lane.b32.xlu0 %v126_v1, %s444_s23  ;;  %v127_v4 = vld [vmem:[%s510_s22 + $0x8] sm:$0xff]  ;;  %p398_p12 = pnand %p397_p11, %p496_p5  ;;  %p402_p1 = scmp.lt.s32.totalorder %s400_s14, %s396_s10 }
  0x18   : > { %170 = vrot.lane.b32.xlu2 %v132_v2, %s444_s23  ;;  %v133_v5 = vld [vmem:[%s510_s22 + $0x38] sm:$0xff]  ;;  %v136_v7 = vld [vmem:[%s510_s22 + $0x50] sm:$0xff]  ;;  %v130_v9 = vld [vmem:[%s510_s22 + $0x20] sm:$0xff] }
  0x19   : > { %v137_v6 = vld [vmem:[%s510_s22 + $0x58] sm:$0xff]  ;;  %v140_v8 = vld [vmem:[%s510_s22 + $0x70] sm:$0xff]  ;;  %v131_v11 = vld [vmem:[%s510_s22 + $0x28] sm:$0xff]  ;;  %125 = vst.msk [vmem:[%s531_s26 + $0x60] sm:$0xff] %vm121_vm0, %v445_v16  ;;  %p399_p13 = pneg %p398_p12  ;;  %p403_p2 = por %p402_p1, %p401_p0 }
  0x1a   : > { %v141_v10 = vld [vmem:[%s510_s22 + $0x78] sm:$0xff]  ;;  %v135_v12 = vld [vmem:[%s510_s22 + $0x48] sm:$0xff]  ;;  %v134_v13 = vld [vmem:[%s510_s22 + $0x40] sm:$0xff] }
  0x1b   : > { %v138_v14 = vld [vmem:[%s510_s22 + $0x60] sm:$0xff]  ;;  %v139_v15 = vld [vmem:[%s510_s22 + $0x68] sm:$0xff]  ;;  %p404_p3 = pnand %p403_p2, %p399_p13 }
  0x1f   : > { %164 = vrot.lane.b32.xlu1 %v129_v3, %s444_s23  ;;  %160 = vrot.lane.b32.xlu0 %v127_v4, %s444_s23 }
  0x20   : > { %172 = vrot.lane.b32.xlu2 %v133_v5, %s444_s23 }
  0x27   : > { %180 = vrot.lane.b32.xlu1 %v137_v6, %s444_s23  ;;  %178 = vrot.lane.b32.xlu0 %v136_v7, %s444_s23 }
  0x28   : > { %186 = vrot.lane.b32.xlu2 %v140_v8, %s444_s23 }
  0x2f   : > { %166 = vrot.lane.b32.xlu1 %v130_v9, %s444_s23  ;;  %188 = vrot.lane.b32.xlu0 %v141_v10, %s444_s23 }
  0x30   : > { %168 = vrot.lane.b32.xlu2 %v131_v11, %s444_s23 }
  0x37   : > { %176 = vrot.lane.b32.xlu1 %v135_v12, %s444_s23  ;;  %174 = vrot.lane.b32.xlu0 %v134_v13, %s444_s23 }
  0x38   : > { %182 = vrot.lane.b32.xlu2 %v138_v14, %s444_s23 }
  0x3f   : > { %184 = vrot.lane.b32.xlu0 %v139_v15, %s444_s23 }
  0x72   : > { %v171_v17 = vpop.permute.xlu2 %170 }
  0x7a   : > { %v173_v18 = vpop.permute.xlu2 %172 }
  0x7b   : > { %v195_v19 = vsel %vm121_vm0, %v171_v17, %v173_v18 }
  0x7c   : > { %227 = vst.msk [vmem:[%s531_s26 + $0x38] sm:$0xff] %vm222_vm1, %v195_v19 }
  0x7d   : > { %238 = vst.msk [vmem:[%s531_s26 + $0x38] sm:$0xff] %vm236_vm2, %v445_v16 }
  0x82   : > { %v187_v20 = vpop.permute.xlu2 %186 }
  0x89   : > { %v163_v21 = vpop.permute.xlu1 %162  ;;  %v159_v22 = vpop.permute.xlu0 %158 }
  0x8a   : > { %219 = vst.msk [vmem:[%s531_s26] sm:$0xff] %vm218_vm3, %v159_v22  ;;  %v169_v23 = vpop.permute.xlu2 %168 }
  0x8b   : > { %v194_v24 = vsel %vm121_vm0, %v169_v23, %v171_v17 }
  0x8c   : > { %226 = vst [vmem:[%s531_s26 + $0x30] sm:$0xff] %v194_v24 }
  0x91   : > { %v165_v25 = vpop.permute.xlu1 %164  ;;  %v161_v26 = vpop.permute.xlu0 %160 }
  0x92   : > { %v192_v27 = vsel %vm121_vm0, %v163_v21, %v165_v25  ;;  %v190_v28 = vsel %vm121_vm0, %v159_v22, %v161_v26  ;;  %v191_v29 = vsel %vm121_vm0, %v161_v26, %v163_v21  ;;  %v183_v30 = vpop.permute.xlu2 %182 }
  0x93   : > { %223 = vst.msk [vmem:[%s531_s26 + $0x18] sm:$0xff] %vm222_vm1, %v192_v27 }
  0x94   : > { %237 = vst.msk [vmem:[%s531_s26 + $0x18] sm:$0xff] %vm236_vm2, %v445_v16 }
  0x95   : > { %220 = vst [vmem:[%s531_s26 + $0x8] sm:$0xff] %v190_v28 }
  0x96   : > { %221 = vst [vmem:[%s531_s26 + $0x10] sm:$0xff] %v191_v29 }
  0x97   : > { %232 = vst.msk [vmem:[%s531_s26 + $0x60] sm:$0xff] %vm218_vm3, %v183_v30 }
  0x99   : > { %v181_v31 = vpop.permute.xlu1 %180  ;;  %v179_v32 = vpop.permute.xlu0 %178 }
  0x9a   : > { %v198_v33 = vsel %vm121_vm0, %v179_v32, %v181_v31 }
  0x9b   : > { %231 = vst.msk [vmem:[%s531_s26 + $0x58] sm:$0xff] %vm222_vm1, %v198_v33 }
  0x9c   : > { %239 = vst.msk [vmem:[%s531_s26 + $0x58] sm:$0xff] %vm236_vm2, %v445_v16 }
  0xa1   : > { %v167_v34 = vpop.permute.xlu1 %166  ;;  %v189_v35 = vpop.permute.xlu0 %188 }
  0xa2   : > { %v193_v36 = vsel %vm121_vm0, %v167_v34, %v169_v23  ;;  %224 = vst.msk [vmem:[%s531_s26 + $0x20] sm:$0xff] %vm218_vm3, %v167_v34  ;;  %v201_v37 = vsel %vm121_vm0, %v187_v20, %v189_v35 }
  0xa3   : > { %225 = vst [vmem:[%s531_s26 + $0x28] sm:$0xff] %v193_v36 }
  0xa4   : > { %235 = vst.msk [vmem:[%s531_s26 + $0x78] sm:$0xff] %vm222_vm1, %v201_v37 }
  0xa5   : > { %240 = vst.msk [vmem:[%s531_s26 + $0x78] sm:$0xff] %vm236_vm2, %v445_v16 }
  0xa9   : > { %v177_v38 = vpop.permute.xlu1 %176  ;;  %v175_v39 = vpop.permute.xlu0 %174 }
  0xaa   : > { %v197_v40 = vsel %vm121_vm0, %v177_v38, %v179_v32  ;;  %v196_v41 = vsel %vm121_vm0, %v175_v39, %v177_v38  ;;  %228 = vst.msk [vmem:[%s531_s26 + $0x40] sm:$0xff] %vm218_vm3, %v175_v39 }
  0xab   : > { %230 = vst [vmem:[%s531_s26 + $0x50] sm:$0xff] %v197_v40 }
  0xac   : > { %229 = vst [vmem:[%s531_s26 + $0x48] sm:$0xff] %v196_v41 }
  0xb1   : > { %v185_v42 = vpop.permute.xlu0 %184 }
  0xb2   : > { %v199_v43 = vsel %vm121_vm0, %v183_v30, %v185_v42  ;;  %v200_v44 = vsel %vm121_vm0, %v185_v42, %v187_v20 }
  0xb3   : > { %233 = vst [vmem:[%s531_s26 + $0x68] sm:$0xff] %v199_v43 }
  0xb4   : > { %234 = vst [vmem:[%s531_s26 + $0x70] sm:$0xff] %v200_v44 }
  0xb5   : > { %407 = shalt.err (!%p404_p3)
}
  0xb6   : > { %s446_s20 = smov 512   ;;  %s447_s21 = smov 32  }
  0xb7   : > { %337 = dma.vmem_to_hbm [thread:$0]  (%p496_p5), %s256_s2, 2048, %s258_s3, %s242_s4, %s446_s20, %s446_s20, %s447_s21  }
  0xb8 PF: > { %p343_p4 = scmp.ge.s32.totalorder %s442_s9, 2  ;;  %s272_s22 = sand.u32 1, %s430_s6  }
  0xb9   : > { %s273_s23 = scalar_lea.sflag [#allocation3], %s272_s22 }
  0xba   : > { %p340_p7 = pnand %p343_p4, %p500_p6 }
  0xbc   : > { %p341_p8 = pneg %p340_p7 }
  0xbe   : > { %425 = dma.done.wait (%p341_p8), %s273_s23, 2048  }
  0xbf   : > { %427 = vsyncadd (%p341_p8), %s273_s23, 4294965248  ;;  %p11_p9 = scmp.ge.s32.totalorder %s483_s12, 6   ;;  %s623_s6 = smov %s434_s7 }
  0xc0   : > { %s624_s7 = smov %s438_s8  ;;  %s625_s8 = smov %s494_s15 }
  0xc1   : > { %s626_s9 = smov %s483_s12  ;;  %13 = sbr.rel (!%p11_p9) target bundleno = 3 (0x3), region = 59 }
  0xc6   :  { %279 = vsyncpa [#allocation3], 1 }
  0xc7   :  { %281 = vsyncpa [#allocation3 + $0x1], 1 }

</bundles_post_ra>
